<compile_context>
chip_gen: v6e
topology: v6e:2x2x1
jax: 0.10.0
libtpu: 0.0.40
codegen_flags: <defaults>
</compile_context>

<pallas_src>
import functools

import jax
import jax.numpy as jnp
from jax.experimental import pallas as pl
from jax.experimental.pallas import tpu as pltpu


# ----------------------------- Pallas kernel --------------------------------
def cnn_lstm_kernel(patch_ref, cwt_ref, wih_t_ref, whh_ref, h0c0_ref,
                    wout_ref, out_ref):
    """Fused conv(+ReLU) -> LSTM -> Linear.

    patch_ref : (T*Bp, W+1) bf16 im2col'd wav patches with a trailing ones
                            column (time-major, batch-minor)
    cwt_ref   : (W+1, C)    bf16 conv weight^T with conv bias as last row
    wih_t_ref : (C, 4H)     bf16 LSTM input->hidden weight, transposed
    whh_ref   : (H+1, 4H)   bf16 [W_hh^T ; (b_ih+b_hh)]
    h0c0_ref  : (Bp, 2H)    f32  [h0, c0] (batch padded to 8 sublanes)
    wout_ref  : (H+1, O)    bf16 [W_out^T ; b_out]
    out_ref   : (Bp, O)     f32
    """
    Bp, HH = h0c0_ref.shape
    H = HH // 2
    TB = patch_ref.shape[0]
    T = TB // Bp

    # Hoist the recurrent weight / bias loads out of the time loop.
    whh_bt = whh_ref[0:H, :]                               # (H, 4H) bf16
    b = whh_ref[H:H + 1, :].astype(jnp.float32)            # (1, 4H)

    # ---- hoisted input path: two batched MXU matmuls over all T*Bp rows ----
    # conv(1,W,stride) on the (1,1,L) view == matmul (+ bias folded in) + ReLU.
    x = jnp.maximum(
        jnp.dot(patch_ref[...], cwt_ref[...],
                preferred_element_type=jnp.float32), 0.0)          # (T*Bp, C)
    # input->hidden projection + summed LSTM biases, all timesteps at once.
    # Kept as a traced value (vreg-resident), no VMEM scratch round-trip.
    pre = (jnp.dot(x.astype(jnp.bfloat16), wih_t_ref[...],
                   preferred_element_type=jnp.float32) + b)        # (T*Bp, 4H)

    h = h0c0_ref[:, 0:H]                                            # (Bp, H)
    c = h0c0_ref[:, H:2 * H]                                        # (Bp, H)

    # ---- serial recurrence: one small bf16 matmul + 3 EUP passes per step --
    # T is a trace-time constant; static Python unroll keeps all slices static.
    for t in range(T):
        gates = pre[t * Bp:(t + 1) * Bp, :] + jnp.dot(
            h.astype(jnp.bfloat16), whh_bt,
            preferred_element_type=jnp.float32)                     # (Bp, 4H)
        sig = jax.nn.sigmoid(gates)       # one full-vreg EUP pass (i, f, o)
        tnh = jnp.tanh(gates)             # one full-vreg EUP pass (g)
        i_g = sig[:, 0 * H:1 * H]
        f_g = sig[:, 1 * H:2 * H]
        o_g = sig[:, 3 * H:4 * H]
        g_g = tnh[:, 2 * H:3 * H]
        c = f_g * c + i_g * g_g
        h = o_g * jnp.tanh(c)

    out_ref[...] = (jnp.dot(h.astype(jnp.bfloat16), wout_ref[0:H, :],
                            preferred_element_type=jnp.float32)
                    + wout_ref[H:H + 1, :].astype(jnp.float32))


# ------------------------------ wrapper (glue) -------------------------------
@functools.partial(jax.jit, static_argnames=("window_size", "stride"))
def cnn_lstm_forward(x, params, h0, c0, *, window_size, stride):
    B, L = x.shape
    T = (L - window_size) // stride + 1
    C = params["conv_w"].shape[0]
    H = params["w_hh"].shape[1]
    O = params["out_w"].shape[0]
    Bp = max(8, ((B + 7) // 8) * 8)            # pad batch to full sublanes

    # im2col (glue): emit patches already laid out as (T*Bp, W), time-major,
    # batch-minor, plus a trailing ones column so the conv bias rides the MXU.
    xp = jnp.zeros((Bp, L), jnp.float32).at[:B].set(x.astype(jnp.float32))
    idx = jnp.arange(T)[:, None] * stride + jnp.arange(window_size)[None, :]
    patches = jnp.transpose(xp[:, idx], (1, 0, 2)).reshape(T * Bp, window_size)
    patches = jnp.concatenate(
        [patches, jnp.ones((T * Bp, 1), jnp.float32)], axis=1)      # (T*Bp, W+1)
    patches = patches.astype(jnp.bfloat16)

    # Pack conv bias / LSTM bias / output bias as extra weight rows (fewer,
    # denser DMAs; bias adds folded into the matmuls).
    cwt = jnp.concatenate(
        [params["conv_w"].T, params["conv_b"].reshape(1, C)],
        axis=0).astype(jnp.bfloat16)                                 # (W+1, C)
    wih_t = params["w_ih"].T.astype(jnp.bfloat16)                    # (C, 4H)
    whh_pack = jnp.concatenate(
        [params["w_hh"].T,
         (params["b_ih"] + params["b_hh"]).reshape(1, 4 * H)],
        axis=0).astype(jnp.bfloat16)                                 # (H+1, 4H)
    wout_pack = jnp.concatenate(
        [params["out_w"].T, params["out_b"].reshape(1, O)],
        axis=0).astype(jnp.bfloat16)                                 # (H+1, O)

    h0p = jnp.zeros((Bp, H), jnp.float32).at[:B].set(h0)
    c0p = jnp.zeros((Bp, H), jnp.float32).at[:B].set(c0)
    h0c0 = jnp.concatenate([h0p, c0p], axis=1)                       # (Bp, 2H)

    vmem = pl.BlockSpec(memory_space=pltpu.MemorySpace.VMEM)
    out = pl.pallas_call(
        cnn_lstm_kernel,
        out_shape=jax.ShapeDtypeStruct((Bp, O), jnp.float32),
        in_specs=[vmem] * 6,
        out_specs=vmem,
    )(patches, cwt, wih_t, whh_pack, h0c0, wout_pack)
    return out[:B]


# --------------------------- pure-JAX reference ------------------------------
def ref_forward(x, params, h0, c0, *, window_size, stride):
    B, L = x.shape
    T = (L - window_size) // stride + 1
    H = h0.shape[-1]
    idx = jnp.arange(T)[:, None] * stride + jnp.arange(window_size)[None, :]
    patches = x[:, idx]                                             # (B, T, W)
    feat = jax.nn.relu(
        jnp.einsum("btw,cw->btc", patches, params["conv_w"]) + params["conv_b"])

    def step(carry, x_t):
        h, c = carry
        gates = (x_t @ params["w_ih"].T + params["b_ih"]
                 + h @ params["w_hh"].T + params["b_hh"])
        i = jax.nn.sigmoid(gates[:, :H])
        f = jax.nn.sigmoid(gates[:, H:2 * H])
        g = jnp.tanh(gates[:, 2 * H:3 * H])
        o = jax.nn.sigmoid(gates[:, 3 * H:4 * H])
        c = f * c + i * g
        h = o * jnp.tanh(c)
        return (h, c), None

    (h, _), _ = jax.lax.scan(step, (h0, c0), jnp.transpose(feat, (1, 0, 2)))
    return h @ params["out_w"].T + params["out_b"]


# ---------------------------------- main -------------------------------------
if __name__ == "__main__":
    # Module config (args): input_dim=1, output_dim=3, hidden_dim=32,
    # num_layers=1, bidirectional=False, out_channels=16, window_size=4, stride=2
    B, L = 2, 18
    WIN, STRIDE = 4, 2
    C_OUT, HID, OUT_DIM = 16, 32, 3

    key = jax.random.PRNGKey(0)
    ks = jax.random.split(key, 10)
    scale = 0.1
    params = {
        # Conv2d(1, C_OUT, (1, WIN)) weight (C_OUT,1,1,WIN) squeezed to (C_OUT, WIN)
        "conv_w": scale * jax.random.normal(ks[0], (C_OUT, WIN), jnp.float32),
        "conv_b": scale * jax.random.normal(ks[1], (C_OUT,), jnp.float32),
        # nn.LSTM(C_OUT, HID) layer-0 params, PyTorch gate order (i, f, g, o)
        "w_ih": scale * jax.random.normal(ks[2], (4 * HID, C_OUT), jnp.float32),
        "w_hh": scale * jax.random.normal(ks[3], (4 * HID, HID), jnp.float32),
        "b_ih": scale * jax.random.normal(ks[4], (4 * HID,), jnp.float32),
        "b_hh": scale * jax.random.normal(ks[5], (4 * HID,), jnp.float32),
        # nn.Linear(HID * num_directions, OUT_DIM)
        "out_w": scale * jax.random.normal(ks[6], (OUT_DIM, HID), jnp.float32),
        "out_b": scale * jax.random.normal(ks[7], (OUT_DIM,), jnp.float32),
    }
    # Deterministic stand-in for init_hidden()'s torch.randn.
    h0 = jax.random.normal(ks[8], (B, HID), jnp.float32)
    c0 = jax.random.normal(ks[9], (B, HID), jnp.float32)

    x = jax.random.normal(key, (B, L), jnp.float32)

    out = cnn_lstm_forward(x, params, h0, c0, window_size=WIN, stride=STRIDE)
    out = jax.block_until_ready(out)

    ref = ref_forward(x, params, h0, c0, window_size=WIN, stride=STRIDE)
    assert out.shape == (B, OUT_DIM), out.shape
    assert jnp.allclose(out, ref, atol=1e-2, rtol=1e-2), (
        f"max abs diff {jnp.max(jnp.abs(out - ref))}")

    print("KERNEL_OK")
</pallas_src>

<mosaic_0001>
module attributes {stable_mosaic.version = 11 : i64} {
  func.func @cnn_lstm_kernel(%arg0: memref<64x5xbf16, #tpu.memory_space<vmem>>, %arg1: memref<5x16xbf16, #tpu.memory_space<vmem>>, %arg2: memref<16x128xbf16, #tpu.memory_space<vmem>>, %arg3: memref<33x128xbf16, #tpu.memory_space<vmem>>, %arg4: memref<8x64xf32, #tpu.memory_space<vmem>>, %arg5: memref<33x3xbf16, #tpu.memory_space<vmem>>, %arg6: memref<8x3xf32, #tpu.memory_space<vmem>>) attributes {dimension_semantics = [], scalar_prefetch = 0 : i64, scratch_operands = 0 : i64, tpu.core_type = #tpu.core_type<tc>} {
    %c0 = arith.constant 0 : index
    %c0_0 = arith.constant 0 : index
    %0 = vector.load %arg3[%c0, %c0_0] : memref<33x128xbf16, #tpu.memory_space<vmem>>, vector<32x128xbf16>
    %c32 = arith.constant 32 : index
    %c0_1 = arith.constant 0 : index
    %1 = vector.load %arg3[%c32, %c0_1] : memref<33x128xbf16, #tpu.memory_space<vmem>>, vector<1x128xbf16>
    %2 = arith.extf %1 : vector<1x128xbf16> to vector<1x128xf32>
    %c0_2 = arith.constant 0 : index
    %c0_3 = arith.constant 0 : index
    %3 = vector.load %arg0[%c0_2, %c0_3] : memref<64x5xbf16, #tpu.memory_space<vmem>>, vector<64x5xbf16>
    %c0_4 = arith.constant 0 : index
    %c0_5 = arith.constant 0 : index
    %4 = vector.load %arg1[%c0_4, %c0_5] : memref<5x16xbf16, #tpu.memory_space<vmem>>, vector<5x16xbf16>
    %cst = arith.constant dense<0.000000e+00> : vector<64x16xf32>
    %5 = tpu.matmul %3, %4, %cst {dimension_numbers = #tpu.dot_dimension_numbers<[1], [0], [0], [1], [0, 0, 1, 1], [], []>} : vector<64x5xbf16>, vector<5x16xbf16>, vector<64x16xf32> -> vector<64x16xf32>
    %cst_6 = arith.constant 0.000000e+00 : f32
    %6 = vector.broadcast %cst_6 : f32 to vector<64x16xf32>
    %7 = arith.maximumf %5, %6 : vector<64x16xf32>
    %8 = arith.truncf %7 : vector<64x16xf32> to vector<64x16xbf16>
    %c0_7 = arith.constant 0 : index
    %c0_8 = arith.constant 0 : index
    %9 = vector.load %arg2[%c0_7, %c0_8] : memref<16x128xbf16, #tpu.memory_space<vmem>>, vector<16x128xbf16>
    %cst_9 = arith.constant dense<0.000000e+00> : vector<64x128xf32>
    %10 = tpu.matmul %8, %9, %cst_9 {dimension_numbers = #tpu.dot_dimension_numbers<[1], [0], [0], [1], [0, 0, 1, 1], [], []>} : vector<64x16xbf16>, vector<16x128xbf16>, vector<64x128xf32> -> vector<64x128xf32>
    %11 = vector.broadcast %2 : vector<1x128xf32> to vector<64x128xf32>
    %12 = arith.addf %10, %11 : vector<64x128xf32>
    %c0_10 = arith.constant 0 : index
    %c0_11 = arith.constant 0 : index
    %13 = vector.load %arg4[%c0_10, %c0_11] : memref<8x64xf32, #tpu.memory_space<vmem>>, vector<8x32xf32>
    %c0_12 = arith.constant 0 : index
    %c32_13 = arith.constant 32 : index
    %14 = vector.load %arg4[%c0_12, %c32_13] : memref<8x64xf32, #tpu.memory_space<vmem>>, vector<8x32xf32>
    %15 = vector.extract_strided_slice %12 {offsets = [0, 0], sizes = [8, 128], strides = [1, 1]} : vector<64x128xf32> to vector<8x128xf32>
    %16 = arith.truncf %13 : vector<8x32xf32> to vector<8x32xbf16>
    %cst_14 = arith.constant dense<0.000000e+00> : vector<8x128xf32>
    %17 = tpu.matmul %16, %0, %cst_14 {dimension_numbers = #tpu.dot_dimension_numbers<[1], [0], [0], [1], [0, 0, 1, 1], [], []>} : vector<8x32xbf16>, vector<32x128xbf16>, vector<8x128xf32> -> vector<8x128xf32>
    %18 = arith.addf %15, %17 : vector<8x128xf32>
    %19 = arith.negf %18 : vector<8x128xf32>
    %20 = math.exp %19 : vector<8x128xf32>
    %cst_15 = arith.constant 1.000000e+00 : f32
    %21 = vector.broadcast %cst_15 : f32 to vector<8x128xf32>
    %22 = arith.addf %21, %20 : vector<8x128xf32>
    %23 = arith.divf %21, %22 : vector<8x128xf32>
    %24 = math.tanh %18 : vector<8x128xf32>
    %25 = vector.extract_strided_slice %23 {offsets = [0, 0], sizes = [8, 32], strides = [1, 1]} : vector<8x128xf32> to vector<8x32xf32>
    %26 = vector.extract_strided_slice %23 {offsets = [0, 32], sizes = [8, 32], strides = [1, 1]} : vector<8x128xf32> to vector<8x32xf32>
    %27 = vector.extract_strided_slice %23 {offsets = [0, 96], sizes = [8, 32], strides = [1, 1]} : vector<8x128xf32> to vector<8x32xf32>
    %28 = vector.extract_strided_slice %24 {offsets = [0, 64], sizes = [8, 32], strides = [1, 1]} : vector<8x128xf32> to vector<8x32xf32>
    %29 = arith.mulf %26, %14 : vector<8x32xf32>
    %30 = arith.mulf %25, %28 : vector<8x32xf32>
    %31 = arith.addf %29, %30 : vector<8x32xf32>
    %32 = math.tanh %31 : vector<8x32xf32>
    %33 = arith.mulf %27, %32 : vector<8x32xf32>
    %34 = vector.extract_strided_slice %12 {offsets = [8, 0], sizes = [8, 128], strides = [1, 1]} : vector<64x128xf32> to vector<8x128xf32>
    %35 = arith.truncf %33 : vector<8x32xf32> to vector<8x32xbf16>
    %cst_16 = arith.constant dense<0.000000e+00> : vector<8x128xf32>
    %36 = tpu.matmul %35, %0, %cst_16 {dimension_numbers = #tpu.dot_dimension_numbers<[1], [0], [0], [1], [0, 0, 1, 1], [], []>} : vector<8x32xbf16>, vector<32x128xbf16>, vector<8x128xf32> -> vector<8x128xf32>
    %37 = arith.addf %34, %36 : vector<8x128xf32>
    %38 = arith.negf %37 : vector<8x128xf32>
    %39 = math.exp %38 : vector<8x128xf32>
    %cst_17 = arith.constant 1.000000e+00 : f32
    %40 = vector.broadcast %cst_17 : f32 to vector<8x128xf32>
    %41 = arith.addf %40, %39 : vector<8x128xf32>
    %42 = arith.divf %40, %41 : vector<8x128xf32>
    %43 = math.tanh %37 : vector<8x128xf32>
    %44 = vector.extract_strided_slice %42 {offsets = [0, 0], sizes = [8, 32], strides = [1, 1]} : vector<8x128xf32> to vector<8x32xf32>
    %45 = vector.extract_strided_slice %42 {offsets = [0, 32], sizes = [8, 32], strides = [1, 1]} : vector<8x128xf32> to vector<8x32xf32>
    %46 = vector.extract_strided_slice %42 {offsets = [0, 96], sizes = [8, 32], strides = [1, 1]} : vector<8x128xf32> to vector<8x32xf32>
    %47 = vector.extract_strided_slice %43 {offsets = [0, 64], sizes = [8, 32], strides = [1, 1]} : vector<8x128xf32> to vector<8x32xf32>
    %48 = arith.mulf %45, %31 : vector<8x32xf32>
    %49 = arith.mulf %44, %47 : vector<8x32xf32>
    %50 = arith.addf %48, %49 : vector<8x32xf32>
    %51 = math.tanh %50 : vector<8x32xf32>
    %52 = arith.mulf %46, %51 : vector<8x32xf32>
    %53 = vector.extract_strided_slice %12 {offsets = [16, 0], sizes = [8, 128], strides = [1, 1]} : vector<64x128xf32> to vector<8x128xf32>
    %54 = arith.truncf %52 : vector<8x32xf32> to vector<8x32xbf16>
    %cst_18 = arith.constant dense<0.000000e+00> : vector<8x128xf32>
    %55 = tpu.matmul %54, %0, %cst_18 {dimension_numbers = #tpu.dot_dimension_numbers<[1], [0], [0], [1], [0, 0, 1, 1], [], []>} : vector<8x32xbf16>, vector<32x128xbf16>, vector<8x128xf32> -> vector<8x128xf32>
    %56 = arith.addf %53, %55 : vector<8x128xf32>
    %57 = arith.negf %56 : vector<8x128xf32>
    %58 = math.exp %57 : vector<8x128xf32>
    %cst_19 = arith.constant 1.000000e+00 : f32
    %59 = vector.broadcast %cst_19 : f32 to vector<8x128xf32>
    %60 = arith.addf %59, %58 : vector<8x128xf32>
    %61 = arith.divf %59, %60 : vector<8x128xf32>
    %62 = math.tanh %56 : vector<8x128xf32>
    %63 = vector.extract_strided_slice %61 {offsets = [0, 0], sizes = [8, 32], strides = [1, 1]} : vector<8x128xf32> to vector<8x32xf32>
    %64 = vector.extract_strided_slice %61 {offsets = [0, 32], sizes = [8, 32], strides = [1, 1]} : vector<8x128xf32> to vector<8x32xf32>
    %65 = vector.extract_strided_slice %61 {offsets = [0, 96], sizes = [8, 32], strides = [1, 1]} : vector<8x128xf32> to vector<8x32xf32>
    %66 = vector.extract_strided_slice %62 {offsets = [0, 64], sizes = [8, 32], strides = [1, 1]} : vector<8x128xf32> to vector<8x32xf32>
    %67 = arith.mulf %64, %50 : vector<8x32xf32>
    %68 = arith.mulf %63, %66 : vector<8x32xf32>
    %69 = arith.addf %67, %68 : vector<8x32xf32>
    %70 = math.tanh %69 : vector<8x32xf32>
    %71 = arith.mulf %65, %70 : vector<8x32xf32>
    %72 = vector.extract_strided_slice %12 {offsets = [24, 0], sizes = [8, 128], strides = [1, 1]} : vector<64x128xf32> to vector<8x128xf32>
    %73 = arith.truncf %71 : vector<8x32xf32> to vector<8x32xbf16>
    %cst_20 = arith.constant dense<0.000000e+00> : vector<8x128xf32>
    %74 = tpu.matmul %73, %0, %cst_20 {dimension_numbers = #tpu.dot_dimension_numbers<[1], [0], [0], [1], [0, 0, 1, 1], [], []>} : vector<8x32xbf16>, vector<32x128xbf16>, vector<8x128xf32> -> vector<8x128xf32>
    %75 = arith.addf %72, %74 : vector<8x128xf32>
    %76 = arith.negf %75 : vector<8x128xf32>
    %77 = math.exp %76 : vector<8x128xf32>
    %cst_21 = arith.constant 1.000000e+00 : f32
    %78 = vector.broadcast %cst_21 : f32 to vector<8x128xf32>
    %79 = arith.addf %78, %77 : vector<8x128xf32>
    %80 = arith.divf %78, %79 : vector<8x128xf32>
    %81 = math.tanh %75 : vector<8x128xf32>
    %82 = vector.extract_strided_slice %80 {offsets = [0, 0], sizes = [8, 32], strides = [1, 1]} : vector<8x128xf32> to vector<8x32xf32>
    %83 = vector.extract_strided_slice %80 {offsets = [0, 32], sizes = [8, 32], strides = [1, 1]} : vector<8x128xf32> to vector<8x32xf32>
    %84 = vector.extract_strided_slice %80 {offsets = [0, 96], sizes = [8, 32], strides = [1, 1]} : vector<8x128xf32> to vector<8x32xf32>
    %85 = vector.extract_strided_slice %81 {offsets = [0, 64], sizes = [8, 32], strides = [1, 1]} : vector<8x128xf32> to vector<8x32xf32>
    %86 = arith.mulf %83, %69 : vector<8x32xf32>
    %87 = arith.mulf %82, %85 : vector<8x32xf32>
    %88 = arith.addf %86, %87 : vector<8x32xf32>
    %89 = math.tanh %88 : vector<8x32xf32>
    %90 = arith.mulf %84, %89 : vector<8x32xf32>
    %91 = vector.extract_strided_slice %12 {offsets = [32, 0], sizes = [8, 128], strides = [1, 1]} : vector<64x128xf32> to vector<8x128xf32>
    %92 = arith.truncf %90 : vector<8x32xf32> to vector<8x32xbf16>
    %cst_22 = arith.constant dense<0.000000e+00> : vector<8x128xf32>
    %93 = tpu.matmul %92, %0, %cst_22 {dimension_numbers = #tpu.dot_dimension_numbers<[1], [0], [0], [1], [0, 0, 1, 1], [], []>} : vector<8x32xbf16>, vector<32x128xbf16>, vector<8x128xf32> -> vector<8x128xf32>
    %94 = arith.addf %91, %93 : vector<8x128xf32>
    %95 = arith.negf %94 : vector<8x128xf32>
    %96 = math.exp %95 : vector<8x128xf32>
    %cst_23 = arith.constant 1.000000e+00 : f32
    %97 = vector.broadcast %cst_23 : f32 to vector<8x128xf32>
    %98 = arith.addf %97, %96 : vector<8x128xf32>
    %99 = arith.divf %97, %98 : vector<8x128xf32>
    %100 = math.tanh %94 : vector<8x128xf32>
    %101 = vector.extract_strided_slice %99 {offsets = [0, 0], sizes = [8, 32], strides = [1, 1]} : vector<8x128xf32> to vector<8x32xf32>
    %102 = vector.extract_strided_slice %99 {offsets = [0, 32], sizes = [8, 32], strides = [1, 1]} : vector<8x128xf32> to vector<8x32xf32>
    %103 = vector.extract_strided_slice %99 {offsets = [0, 96], sizes = [8, 32], strides = [1, 1]} : vector<8x128xf32> to vector<8x32xf32>
    %104 = vector.extract_strided_slice %100 {offsets = [0, 64], sizes = [8, 32], strides = [1, 1]} : vector<8x128xf32> to vector<8x32xf32>
    %105 = arith.mulf %102, %88 : vector<8x32xf32>
    %106 = arith.mulf %101, %104 : vector<8x32xf32>
    %107 = arith.addf %105, %106 : vector<8x32xf32>
    %108 = math.tanh %107 : vector<8x32xf32>
    %109 = arith.mulf %103, %108 : vector<8x32xf32>
    %110 = vector.extract_strided_slice %12 {offsets = [40, 0], sizes = [8, 128], strides = [1, 1]} : vector<64x128xf32> to vector<8x128xf32>
    %111 = arith.truncf %109 : vector<8x32xf32> to vector<8x32xbf16>
    %cst_24 = arith.constant dense<0.000000e+00> : vector<8x128xf32>
    %112 = tpu.matmul %111, %0, %cst_24 {dimension_numbers = #tpu.dot_dimension_numbers<[1], [0], [0], [1], [0, 0, 1, 1], [], []>} : vector<8x32xbf16>, vector<32x128xbf16>, vector<8x128xf32> -> vector<8x128xf32>
    %113 = arith.addf %110, %112 : vector<8x128xf32>
    %114 = arith.negf %113 : vector<8x128xf32>
    %115 = math.exp %114 : vector<8x128xf32>
    %cst_25 = arith.constant 1.000000e+00 : f32
    %116 = vector.broadcast %cst_25 : f32 to vector<8x128xf32>
    %117 = arith.addf %116, %115 : vector<8x128xf32>
    %118 = arith.divf %116, %117 : vector<8x128xf32>
    %119 = math.tanh %113 : vector<8x128xf32>
    %120 = vector.extract_strided_slice %118 {offsets = [0, 0], sizes = [8, 32], strides = [1, 1]} : vector<8x128xf32> to vector<8x32xf32>
    %121 = vector.extract_strided_slice %118 {offsets = [0, 32], sizes = [8, 32], strides = [1, 1]} : vector<8x128xf32> to vector<8x32xf32>
    %122 = vector.extract_strided_slice %118 {offsets = [0, 96], sizes = [8, 32], strides = [1, 1]} : vector<8x128xf32> to vector<8x32xf32>
    %123 = vector.extract_strided_slice %119 {offsets = [0, 64], sizes = [8, 32], strides = [1, 1]} : vector<8x128xf32> to vector<8x32xf32>
    %124 = arith.mulf %121, %107 : vector<8x32xf32>
    %125 = arith.mulf %120, %123 : vector<8x32xf32>
    %126 = arith.addf %124, %125 : vector<8x32xf32>
    %127 = math.tanh %126 : vector<8x32xf32>
    %128 = arith.mulf %122, %127 : vector<8x32xf32>
    %129 = vector.extract_strided_slice %12 {offsets = [48, 0], sizes = [8, 128], strides = [1, 1]} : vector<64x128xf32> to vector<8x128xf32>
    %130 = arith.truncf %128 : vector<8x32xf32> to vector<8x32xbf16>
    %cst_26 = arith.constant dense<0.000000e+00> : vector<8x128xf32>
    %131 = tpu.matmul %130, %0, %cst_26 {dimension_numbers = #tpu.dot_dimension_numbers<[1], [0], [0], [1], [0, 0, 1, 1], [], []>} : vector<8x32xbf16>, vector<32x128xbf16>, vector<8x128xf32> -> vector<8x128xf32>
    %132 = arith.addf %129, %131 : vector<8x128xf32>
    %133 = arith.negf %132 : vector<8x128xf32>
    %134 = math.exp %133 : vector<8x128xf32>
    %cst_27 = arith.constant 1.000000e+00 : f32
    %135 = vector.broadcast %cst_27 : f32 to vector<8x128xf32>
    %136 = arith.addf %135, %134 : vector<8x128xf32>
    %137 = arith.divf %135, %136 : vector<8x128xf32>
    %138 = math.tanh %132 : vector<8x128xf32>
    %139 = vector.extract_strided_slice %137 {offsets = [0, 0], sizes = [8, 32], strides = [1, 1]} : vector<8x128xf32> to vector<8x32xf32>
    %140 = vector.extract_strided_slice %137 {offsets = [0, 32], sizes = [8, 32], strides = [1, 1]} : vector<8x128xf32> to vector<8x32xf32>
    %141 = vector.extract_strided_slice %137 {offsets = [0, 96], sizes = [8, 32], strides = [1, 1]} : vector<8x128xf32> to vector<8x32xf32>
    %142 = vector.extract_strided_slice %138 {offsets = [0, 64], sizes = [8, 32], strides = [1, 1]} : vector<8x128xf32> to vector<8x32xf32>
    %143 = arith.mulf %140, %126 : vector<8x32xf32>
    %144 = arith.mulf %139, %142 : vector<8x32xf32>
    %145 = arith.addf %143, %144 : vector<8x32xf32>
    %146 = math.tanh %145 : vector<8x32xf32>
    %147 = arith.mulf %141, %146 : vector<8x32xf32>
    %148 = vector.extract_strided_slice %12 {offsets = [56, 0], sizes = [8, 128], strides = [1, 1]} : vector<64x128xf32> to vector<8x128xf32>
    %149 = arith.truncf %147 : vector<8x32xf32> to vector<8x32xbf16>
    %cst_28 = arith.constant dense<0.000000e+00> : vector<8x128xf32>
    %150 = tpu.matmul %149, %0, %cst_28 {dimension_numbers = #tpu.dot_dimension_numbers<[1], [0], [0], [1], [0, 0, 1, 1], [], []>} : vector<8x32xbf16>, vector<32x128xbf16>, vector<8x128xf32> -> vector<8x128xf32>
    %151 = arith.addf %148, %150 : vector<8x128xf32>
    %152 = arith.negf %151 : vector<8x128xf32>
    %153 = math.exp %152 : vector<8x128xf32>
    %cst_29 = arith.constant 1.000000e+00 : f32
    %154 = vector.broadcast %cst_29 : f32 to vector<8x128xf32>
    %155 = arith.addf %154, %153 : vector<8x128xf32>
    %156 = arith.divf %154, %155 : vector<8x128xf32>
    %157 = math.tanh %151 : vector<8x128xf32>
    %158 = vector.extract_strided_slice %156 {offsets = [0, 0], sizes = [8, 32], strides = [1, 1]} : vector<8x128xf32> to vector<8x32xf32>
    %159 = vector.extract_strided_slice %156 {offsets = [0, 32], sizes = [8, 32], strides = [1, 1]} : vector<8x128xf32> to vector<8x32xf32>
    %160 = vector.extract_strided_slice %156 {offsets = [0, 96], sizes = [8, 32], strides = [1, 1]} : vector<8x128xf32> to vector<8x32xf32>
    %161 = vector.extract_strided_slice %157 {offsets = [0, 64], sizes = [8, 32], strides = [1, 1]} : vector<8x128xf32> to vector<8x32xf32>
    %162 = arith.mulf %159, %145 : vector<8x32xf32>
    %163 = arith.mulf %158, %161 : vector<8x32xf32>
    %164 = arith.addf %162, %163 : vector<8x32xf32>
    %165 = math.tanh %164 : vector<8x32xf32>
    %166 = arith.mulf %160, %165 : vector<8x32xf32>
    %167 = arith.truncf %166 : vector<8x32xf32> to vector<8x32xbf16>
    %c0_30 = arith.constant 0 : index
    %c0_31 = arith.constant 0 : index
    %168 = vector.load %arg5[%c0_30, %c0_31] : memref<33x3xbf16, #tpu.memory_space<vmem>>, vector<32x3xbf16>
    %cst_32 = arith.constant dense<0.000000e+00> : vector<8x3xf32>
    %169 = tpu.matmul %167, %168, %cst_32 {dimension_numbers = #tpu.dot_dimension_numbers<[1], [0], [0], [1], [0, 0, 1, 1], [], []>} : vector<8x32xbf16>, vector<32x3xbf16>, vector<8x3xf32> -> vector<8x3xf32>
    %c32_33 = arith.constant 32 : index
    %c0_34 = arith.constant 0 : index
    %170 = vector.load %arg5[%c32_33, %c0_34] : memref<33x3xbf16, #tpu.memory_space<vmem>>, vector<1x3xbf16>
    %171 = arith.extf %170 : vector<1x3xbf16> to vector<1x3xf32>
    %172 = vector.broadcast %171 : vector<1x3xf32> to vector<8x3xf32>
    %173 = arith.addf %169, %172 : vector<8x3xf32>
    %c0_35 = arith.constant 0 : index
    %c0_36 = arith.constant 0 : index
    %174 = vector.load %arg6[%c0_35, %c0_36] : memref<8x3xf32, #tpu.memory_space<vmem>>, vector<8x3xf32>
    tpu.vector_store %arg6[%c0_35, %c0_36], %173 {strides = array<i32>} : memref<8x3xf32, #tpu.memory_space<vmem>>, vector<8x3xf32>,
    return
  }
}

</mosaic_0001>

<bundles_post_ra>
// kernel: cnn_lstm_forward.1
= control target key start
LH: loop header
LB: loop body
LE: loop exit
PB: predicated region body
PF: predicated region fallthrough
CT: control target
= control target key end

     0   :  { %vm72_vm0 = vcmask 1041408   ;;  %vm73_vm1 = vcmask 1042432   ;;  %vm59_vm2 = vcmask 39936   ;;  %v1149_v1 = vmov 65535   ;;  %s1153_s13 = smov 32   ;;  %s1376_s1 = inlined_call_operand.vmem [shape: bf16[5,16], index: 1, kind: input, shape index: {}]   ;;  %s1377_s0 = inlined_call_operand.vmem [shape: bf16[64,5], index: 0, kind: input, shape index: {}]   ;;  %s1378_s3 = inlined_call_operand.vmem [shape: bf16[33,128], index: 3, kind: input, shape index: {}]   ;;  %s1379_s2 = inlined_call_operand.vmem [shape: bf16[16,128], index: 2, kind: input, shape index: {}]   ;;  %s1380_s4 = inlined_call_operand.vmem [shape: f32[8,64], index: 4, kind: input, shape index: {}]   ;;  %s1381_s5 = inlined_call_operand.vmem [shape: bf16[33,3], index: 5, kind: input, shape index: {}]   ;;  %s1382_s6 = inlined_call_operand.vmem [shape: f32[8,3], index: 6, kind: output, shape index: {}]  }
   0x1   :  { %v38_v0 = vld [vmem:[%s1376_s1] sm:$0x7]  ;;  %v74_v2 = vsel %vm72_vm0, 4294967295, %v1149_v1  ;;  %v1077_v6 = vld [vmem:[%s1377_s0 + $0x8] sm:$0xff]   ;;  %v1078_v7 = vld [vmem:[%s1377_s0 + $0x10] sm:$0xff]   ;;  %v1150_v8 = vmov 0.0   ;;  %v158_v39 = vlaneseq }
   0x2   :  { %v1076_v3 = vld [vmem:[%s1377_s0] sm:$0xff]   ;;  %v75_v4 = vsel %vm73_vm1, %v74_v2, 0  ;;  %v1079_v9 = vld [vmem:[%s1377_s0 + $0x18] sm:$0xff]   ;;  %v1212_v10 = vld [vmem:[%s1378_s3 + $0x8] sm:$0xff]   ;;  %vm260_vm3 = vcmask 261120   ;;  %vm1151_vm4 = vmmov 0  }
   0x3   :  { %v77_v5 = vand.u32 %v75_v4, %v38_v0  ;;  %981 = vmatprep.mubr.msk.bf16.mxu0 %vm59_vm2, %v1076_v3  ;;  %v1219_v11 = vld [vmem:[%s1378_s3] sm:$0xff]   ;;  %vm168_vm5 = vcmask 130048   ;;  %v1253_v40 = vshrl.u32 %v158_v39, 7  ;;  %v28_v41 = vld [vmem:[%s1378_s3 + $0x10] sm:$0x1]  ;;  %s1152_s3 = smov 64  }
   0x4   :  { %v1082_v12 = vld [vmem:[%s1379_s2] sm:$0xff]   ;;  %v29_v42 = vunpack.c.l.bf16 %v28_v41  ;;  %vm902_vm6 = vcmask 23552  }
   0x5   :  { %979 = vmatprep.subr.bf16.mxu0 %v77_v5  ;;  %v1228_v13 = vld [vmem:[%s1380_s4] sm:$0xff]  ;;  %989 = vmatprep.subr.bf16.mxu1 %v1082_v12  ;;  %v160_v43 = vsub.s32 0, %v1253_v40 }
   0x6   :  { %980 = vmatpush3.bf16.msra.mxu0 %v77_v5  ;;  %v247_v14 = vpack.c.bf16 %v1228_v13, %v1228_v13  ;;  %990 = vmatpush3.bf16.msra.mxu1 %v1082_v12 }
   0x7   :  { %999 = vmatprep.subr.bf16.mxu0 %v1150_v8  ;;  %1007 = vmatprep.subr.bf16.mxu1 %v1150_v8  ;;  %v1261_v44 = vrot.slane %v29_v42, %v160_v43 }
   0x9   :  { %982 = vmatmul.mubr.msk.bf16.vlgmr.msra.gmra.mxu0 %vm59_vm2, %v1077_v6 }
   0xa   :  { %985 = vmatprep.mubr.msk.bf16.mxu0 %vm59_vm2, %v1078_v7  ;;  %1000 = vmatpush3.bf16.msra.mxu0 %v1212_v10 }
   0xb   :  { %1001 = vmatprep.subr.bf16.mxu0 %v1150_v8 }
   0xe   :  { %1002 = vmatpush3.bf16.msra.mxu0 %v1219_v11 }
   0xf   :  { %1015 = vmatprep.subr.bf16.mxu0 %v1150_v8 }
  0x11   :  { %986 = vmatmul.mubr.msk.bf16.gmra.mxu0 %vm59_vm2, %v1079_v9 }
  0x12   :  { %1003 = vmatprep.mubr.msk.bf16.mxu0 %vm1151_vm4, %v1150_v8 }
  0x19   :  { %1004 = vmatmul.mubr.msk.bf16.vlgmr.msra.gmra.mxu0 %vm260_vm3, %v247_v14 }
  0x1a   :  { %1016 = vmatpush3.bf16.msra.mxu0 %v1212_v10  ;;  %1019 = vmatprep.mubr.msk.bf16.mxu0 %vm1151_vm4, %v1150_v8 }
  0x1b   :  { %1017 = vmatprep.subr.bf16.mxu0 %v1150_v8 }
  0x1e   :  { %1018 = vmatpush3.bf16.msra.mxu0 %v1219_v11 }
  0x1f   :  { %1031 = vmatprep.subr.bf16.mxu0 %v1150_v8 }
  0xc9   :  { %v983_v15 = vpop.f32.mrf.mxu0 }
  0xca   :  { %v146_v22 = vmax.f32 %v983_v15, 0.0 }
  0xcb   :  { %v113_v16 = vpop.f32.mrf.mxu0 }
  0xcc   :  { %v144_v20 = vmax.f32 %v113_v16, 0.0 }
  0xcd   :  { %v984_v17 = vpop.f32.mrf.mxu0 }
  0xce   :  { %v147_v18 = vmax.f32 %v984_v17, 0.0 }
  0xcf   :  { %v116_v19 = vpop.f32.mrf.mxu0 }
  0xd0   :  { %v145_v21 = vmax.f32 %v116_v19, 0.0  ;;  %v153_v25 = vpack.c.bf16 %v147_v18, %v146_v22 }
  0xd1   :  { %v987_v23 = vpop.f32.mrf.mxu0 }
  0xd2   :  { %v152_v24 = vpack.c.bf16 %v145_v21, %v144_v20  ;;  %v150_v27 = vmax.f32 %v987_v23, 0.0 }
  0xd3   :  { %v129_v26 = vpop.f32.mrf.mxu0 }
  0xd4   :  { %991 = vmatprep.mubr.msk.bf16.mxu1 %vm168_vm5, %v152_v24  ;;  %v148_v29 = vmax.f32 %v129_v26, 0.0 }
  0xd5   :  { %992 = vmatmul.mubr.msk.bf16.vlgmr.msra.gmra.mxu1 %vm168_vm5, %v153_v25  ;;  %v988_v28 = vpop.f32.mrf.mxu0 }
  0xd6   :  { %v151_v30 = vmax.f32 %v988_v28, 0.0  ;;  %1008 = vmatpush3.bf16.msra.mxu1 %v1212_v10 }
  0xd7   :  { %v132_v31 = vpop.f32.mrf.mxu0  ;;  %1009 = vmatprep.subr.bf16.mxu1 %v1150_v8 }
  0xd8   :  { %v149_v32 = vmax.f32 %v132_v31, 0.0  ;;  %v155_v33 = vpack.c.bf16 %v151_v30, %v150_v27 }
  0xd9   :  { %v298_v35 = vpop.f32.mrf.mxu0 }
  0xda   :  { %v154_v34 = vpack.c.bf16 %v149_v32, %v148_v29  ;;  %1010 = vmatpush3.bf16.msra.mxu1 %v1219_v11 }
  0xdb   :  { %1023 = vmatprep.subr.bf16.mxu1 %v1150_v8  ;;  %v1005_v36 = vpop.f32.mrf.mxu0 }
  0xdc   :  { %995 = vmatprep.mubr.msk.bf16.mxu1 %vm168_vm5, %v154_v34 }
  0xdd   :  { %996 = vmatmul.mubr.msk.bf16.gmra.mxu1 %vm168_vm5, %v155_v33  ;;  %v301_v37 = vpop.f32.mrf.mxu0 }
  0xde   :  { %1011 = vmatprep.mubr.msk.bf16.mxu1 %vm1151_vm4, %v1150_v8 }
  0xdf   :  { %v1006_v38 = vpop.f32.mrf.mxu0 }
 0x195   :  { %v993_v45 = vpop.f32.mrf.mxu1 }
 0x196   :  { %v1264_v46 = vadd.f32 %v993_v45, %v1261_v44 }
 0x197   :  { %v215_v47 = vpop.f32.mrf.mxu1 }
 0x198   :  { %v216_v48 = vadd.f32 %v215_v47, %v1261_v44 }
 0x199   :  { %v994_v49 = vpop.f32.mrf.mxu1 }
 0x19a   :  { %v304_v50 = vadd.f32 %v298_v35, %v216_v48  ;;  %v1268_v51 = vadd.f32 %v994_v49, %v1261_v44 }
 0x19b   :  { %v218_v52 = vpop.f32.mrf.mxu1 }
 0x19c   :  { %1085 = vtanh.f32 %v304_v50  ;;  %v924_v60 = vmul.f32 -1.442695, %v304_v50  ;;  %v219_v14 = vadd.f32 %v218_v52, %v1261_v44 }
 0x19d   :  { %v997_v53 = vpop.f32.mrf.mxu1 }
 0x19e   :  { %v1271_v54 = vadd.f32 %v997_v53, %v1261_v44  ;;  %1087 = vpow2.f32 %v924_v60 }
 0x19f   :  { %v231_v55 = vpop.f32.mrf.mxu1 }
 0x1a0   :  { %v1274_v56 = vadd.f32 %v231_v55, %v1261_v44 }
 0x1a1   :  { %v998_v57 = vpop.f32.mrf.mxu1 }
 0x1a2   :  { %v1277_v58 = vadd.f32 %v998_v57, %v1261_v44 }
 0x1a9   :  { %v1086_v59 = vpop.eup %1085 }
 0x1aa   :  { %314 = vrot.lane.b32.xlu0 %v1086_v59, %s1152_s3 }
 0x1ab   :  { %v1088_v61 = vpop.eup %1087 }
 0x1ac   :  { %v308_v62 = vadd.f32 1.0, %v1088_v61 }
 0x1ae   :  { %1089 = vrcp.f32 %v308_v62 }
 0x1bb   :  { %v1090_v63 = vpop.eup %1089 }
 0x1bc   :  { %v312_v2 = vmul.f32 %v1090_v63, %v1228_v13  ;;  %v1291_v13 = vpop.f32.mrf.mxu1 }
 0x21c   :  { %v315_v0 = vpop.permute.xlu0 %314 }
 0x21d   :  { %v317_v1 = vmul.f32 %v1090_v63, %v315_v0 }
 0x21f   :  { %319 = vrot.lane.b32.xlu0 %v317_v1, %s1153_s13 }
 0x291   :  { %v320_v3 = vpop.permute.xlu0 %319 }
 0x292   :  { %v322_v4 = vadd.f32 %v320_v3, %v312_v2 }
 0x294   :  { %1091 = vtanh.f32 %v322_v4 }
 0x2a1   :  { %v1092_v5 = vpop.eup %1091 }
 0x2a2   :  { %325 = vrot.lane.b32.xlu1 %v1092_v5, %s1152_s3 }
 0x314   :  { %v326_v6 = vpop.permute.xlu1 %325 }
 0x315   :  { %v328_v7 = vmul.f32 %v1090_v63, %v326_v6 }
 0x317   :  { %v329_v9 = vpack.c.bf16 %v328_v7, %v328_v7 }
 0x319   :  { %331 = vrot.lane.b32.xlu1 %v329_v9, %s1153_s13 }
 0x38b   :  { %v332_v12 = vpop.permute.xlu1 %331 }
 0x38c   :  { %1012 = vmatmul.mubr.msk.bf16.vlgmr.msra.gmra.mxu1 %vm260_vm3, %v332_v12 }
 0x38d   :  { %1024 = vmatpush3.bf16.msra.mxu1 %v1212_v10  ;;  %1027 = vmatprep.mubr.msk.bf16.mxu1 %vm1151_vm4, %v1150_v8 }
 0x38e   :  { %1025 = vmatprep.subr.bf16.mxu1 %v1150_v8 }
 0x391   :  { %1026 = vmatpush3.bf16.msra.mxu1 %v1219_v11 }
 0x392   :  { %1039 = vmatprep.subr.bf16.mxu1 %v1150_v8 }
 0x44c   :  { %v370_v15 = vpop.f32.mrf.mxu1 }
 0x44d   :  { %v376_v16 = vadd.f32 %v370_v15, %v219_v14 }
 0x44e   :  { %v1013_v17 = vpop.f32.mrf.mxu1 }
 0x44f   :  { %1093 = vtanh.f32 %v376_v16  ;;  %v926_v21 = vmul.f32 -1.442695, %v376_v16 }
 0x450   :  { %v373_v18 = vpop.f32.mrf.mxu1 }
 0x451   :  { %1095 = vpow2.f32 %v926_v21 }
 0x452   :  { %v1014_v19 = vpop.f32.mrf.mxu1 }
 0x45c   :  { %v1094_v20 = vpop.eup %1093 }
 0x45d   :  { %386 = vrot.lane.b32.xlu0 %v1094_v20, %s1152_s3 }
 0x45e   :  { %v1096_v22 = vpop.eup %1095 }
 0x45f   :  { %v380_v23 = vadd.f32 1.0, %v1096_v22 }
 0x461   :  { %1097 = vrcp.f32 %v380_v23 }
 0x46e   :  { %v1098_v24 = vpop.eup %1097 }
 0x46f   :  { %v384_v27 = vmul.f32 %v1098_v24, %v322_v4 }
 0x4cf   :  { %v387_v25 = vpop.permute.xlu0 %386 }
 0x4d0   :  { %v389_v26 = vmul.f32 %v1098_v24, %v387_v25 }
 0x4d2   :  { %391 = vrot.lane.b32.xlu1 %v389_v26, %s1153_s13 }
 0x544   :  { %v392_v28 = vpop.permute.xlu1 %391 }
 0x545   :  { %v394_v29 = vadd.f32 %v392_v28, %v384_v27 }
 0x547   :  { %1099 = vtanh.f32 %v394_v29 }
 0x554   :  { %v1100_v30 = vpop.eup %1099 }
 0x555   :  { %397 = vrot.lane.b32.xlu0 %v1100_v30, %s1152_s3 }
 0x5c7   :  { %v398_v31 = vpop.permute.xlu0 %397 }
 0x5c8   :  { %v400_v32 = vmul.f32 %v1098_v24, %v398_v31 }
 0x5ca   :  { %v401_v33 = vpack.c.bf16 %v400_v32, %v400_v32 }
 0x5cc   :  { %403 = vrot.lane.b32.xlu1 %v401_v33, %s1153_s13 }
 0x63e   :  { %v404_v34 = vpop.permute.xlu1 %403 }
 0x63f   :  { %1020 = vmatmul.mubr.msk.bf16.vlgmr.msra.gmra.mxu0 %vm260_vm3, %v404_v34 }
 0x640   :  { %1032 = vmatpush3.bf16.msra.mxu0 %v1212_v10  ;;  %1035 = vmatprep.mubr.msk.bf16.mxu0 %vm1151_vm4, %v1150_v8 }
 0x641   :  { %1033 = vmatprep.subr.bf16.mxu0 %v1150_v8 }
 0x644   :  { %1034 = vmatpush3.bf16.msra.mxu0 %v1219_v11 }
 0x645   :  { %1047 = vmatprep.subr.bf16.mxu0 %v1150_v8 }
 0x6ff   :  { %v442_v35 = vpop.f32.mrf.mxu0 }
 0x700   :  { %v448_v36 = vadd.f32 %v442_v35, %v1264_v46 }
 0x701   :  { %v1021_v37 = vpop.f32.mrf.mxu0 }
 0x702   :  { %1101 = vtanh.f32 %v448_v36  ;;  %v928_v42 = vmul.f32 -1.442695, %v448_v36 }
 0x703   :  { %v445_v38 = vpop.f32.mrf.mxu0 }
 0x704   :  { %1103 = vpow2.f32 %v928_v42 }
 0x705   :  { %v1022_v39 = vpop.f32.mrf.mxu0 }
 0x70f   :  { %v1102_v41 = vpop.eup %1101 }
 0x710   :  { %458 = vrot.lane.b32.xlu0 %v1102_v41, %s1152_s3  ;;  %v235_v41 = vadd.f32 %v1291_v13, %v1261_v44 }
 0x711   :  { %v1104_v45 = vpop.eup %1103 }
 0x712   :  { %v452_v47 = vadd.f32 1.0, %v1104_v45 }
 0x714   :  { %1105 = vrcp.f32 %v452_v47 }
 0x721   :  { %v1106_v48 = vpop.eup %1105 }
 0x722   :  { %v456_v52 = vmul.f32 %v1106_v48, %v394_v29 }
 0x782   :  { %v459_v49 = vpop.permute.xlu0 %458 }
 0x783   :  { %v461_v50 = vmul.f32 %v1106_v48, %v459_v49 }
 0x785   :  { %463 = vrot.lane.b32.xlu1 %v461_v50, %s1153_s13 }
 0x7f7   :  { %v464_v53 = vpop.permute.xlu1 %463 }
 0x7f8   :  { %v466_v46 = vadd.f32 %v464_v53, %v456_v52 }
 0x7fa   :  { %1107 = vtanh.f32 %v466_v46 }
 0x807   :  { %v1108_v55 = vpop.eup %1107 }
 0x808   :  { %469 = vrot.lane.b32.xlu0 %v1108_v55, %s1152_s3 }
 0x87a   :  { %v470_v57 = vpop.permute.xlu0 %469 }
 0x87b   :  { %v472_v59 = vmul.f32 %v1106_v48, %v470_v57 }
 0x87d   :  { %v473_v60 = vpack.c.bf16 %v472_v59, %v472_v59 }
 0x87f   :  { %475 = vrot.lane.b32.xlu1 %v473_v60, %s1153_s13 }
 0x8f1   :  { %v476_v61 = vpop.permute.xlu1 %475 }
 0x8f2   :  { %1028 = vmatmul.mubr.msk.bf16.vlgmr.msra.gmra.mxu1 %vm260_vm3, %v476_v61 }
 0x8f3   :  { %1040 = vmatpush3.bf16.msra.mxu1 %v1212_v10  ;;  %1043 = vmatprep.mubr.msk.bf16.mxu1 %vm1151_vm4, %v1150_v8 }
 0x8f4   :  { %1041 = vmatprep.subr.bf16.mxu1 %v1150_v8 }
 0x8f7   :  { %1042 = vmatpush3.bf16.msra.mxu1 %v1219_v11 }
 0x8f8   :  { %1055 = vmatprep.subr.bf16.mxu1 %v1150_v8 }
 0x9b2   :  { %v514_v62 = vpop.f32.mrf.mxu1 }
 0x9b3   :  { %v520_v63 = vadd.f32 %v514_v62, %v1268_v51 }
 0x9b4   :  { %v1029_v0 = vpop.f32.mrf.mxu1 }
 0x9b5   :  { %1109 = vtanh.f32 %v520_v63  ;;  %v930_v4 = vmul.f32 -1.442695, %v520_v63 }
 0x9b6   :  { %v517_v1 = vpop.f32.mrf.mxu1 }
 0x9b7   :  { %1111 = vpow2.f32 %v930_v4 }
 0x9b8   :  { %v1030_v2 = vpop.f32.mrf.mxu1 }
 0x9c2   :  { %v1110_v3 = vpop.eup %1109 }
 0x9c3   :  { %530 = vrot.lane.b32.xlu0 %v1110_v3, %s1152_s3 }
 0x9c4   :  { %v1112_v5 = vpop.eup %1111 }
 0x9c5   :  { %v524_v6 = vadd.f32 1.0, %v1112_v5 }
 0x9c7   :  { %1113 = vrcp.f32 %v524_v6 }
 0x9d4   :  { %v1114_v7 = vpop.eup %1113 }
 0x9d5   :  { %v528_v14 = vmul.f32 %v1114_v7, %v466_v46 }
 0xa35   :  { %v531_v9 = vpop.permute.xlu0 %530 }
 0xa36   :  { %v533_v12 = vmul.f32 %v1114_v7, %v531_v9 }
 0xa38   :  { %535 = vrot.lane.b32.xlu1 %v533_v12, %s1153_s13 }
 0xaaa   :  { %v536_v15 = vpop.permute.xlu1 %535 }
 0xaab   :  { %v538_v51 = vadd.f32 %v536_v15, %v528_v14 }
 0xaad   :  { %1115 = vtanh.f32 %v538_v51 }
 0xaba   :  { %v1116_v16 = vpop.eup %1115 }
 0xabb   :  { %541 = vrot.lane.b32.xlu0 %v1116_v16, %s1152_s3 }
 0xb2d   :  { %v542_v17 = vpop.permute.xlu0 %541 }
 0xb2e   :  { %v544_v18 = vmul.f32 %v1114_v7, %v542_v17 }
 0xb30   :  { %v545_v19 = vpack.c.bf16 %v544_v18, %v544_v18 }
 0xb32   :  { %547 = vrot.lane.b32.xlu1 %v545_v19, %s1153_s13 }
 0xba4   :  { %v548_v20 = vpop.permute.xlu1 %547 }
 0xba5   :  { %1036 = vmatmul.mubr.msk.bf16.vlgmr.msra.gmra.mxu0 %vm260_vm3, %v548_v20 }
 0xba6   :  { %1048 = vmatpush3.bf16.msra.mxu0 %v1212_v10  ;;  %1051 = vmatprep.mubr.msk.bf16.mxu0 %vm1151_vm4, %v1150_v8 }
 0xba7   :  { %1049 = vmatprep.subr.bf16.mxu0 %v1150_v8 }
 0xbaa   :  { %1050 = vmatpush3.bf16.msra.mxu0 %v1219_v11 }
 0xbab   :  { %1063 = vmatprep.subr.bf16.mxu0 %v1150_v8 }
 0xc65   :  { %v586_v21 = vpop.f32.mrf.mxu0 }
 0xc66   :  { %v592_v22 = vadd.f32 %v586_v21, %v1274_v56 }
 0xc67   :  { %v1037_v23 = vpop.f32.mrf.mxu0 }
 0xc68   :  { %1117 = vtanh.f32 %v592_v22  ;;  %v932_v27 = vmul.f32 -1.442695, %v592_v22 }
 0xc69   :  { %v589_v24 = vpop.f32.mrf.mxu0 }
 0xc6a   :  { %1119 = vpow2.f32 %v932_v27 }
 0xc6b   :  { %v1038_v25 = vpop.f32.mrf.mxu0 }
 0xc75   :  { %v1118_v26 = vpop.eup %1117 }
 0xc76   :  { %602 = vrot.lane.b32.xlu0 %v1118_v26, %s1152_s3 }
 0xc77   :  { %v1120_v28 = vpop.eup %1119 }
 0xc78   :  { %v596_v29 = vadd.f32 1.0, %v1120_v28 }
 0xc7a   :  { %1121 = vrcp.f32 %v596_v29 }
 0xc87   :  { %v1122_v30 = vpop.eup %1121 }
 0xc88   :  { %v600_v33 = vmul.f32 %v1122_v30, %v538_v51 }
 0xce8   :  { %v603_v31 = vpop.permute.xlu0 %602 }
 0xce9   :  { %v605_v32 = vmul.f32 %v1122_v30, %v603_v31 }
 0xceb   :  { %607 = vrot.lane.b32.xlu1 %v605_v32, %s1153_s13 }
 0xd5d   :  { %v608_v34 = vpop.permute.xlu1 %607 }
 0xd5e   :  { %v610_v56 = vadd.f32 %v608_v34, %v600_v33 }
 0xd60   :  { %1123 = vtanh.f32 %v610_v56 }
 0xd6d   :  { %v1124_v35 = vpop.eup %1123 }
 0xd6e   :  { %613 = vrot.lane.b32.xlu0 %v1124_v35, %s1152_s3  ;;  %v1083_v35 = vld [vmem:[%s1381_s5 + $0x8] sm:$0xff]  }
 0xde0   :  { %v614_v36 = vpop.permute.xlu0 %613 }
 0xde1   :  { %v616_v37 = vmul.f32 %v1122_v30, %v614_v36  ;;  %v1084_v36 = vld [vmem:[%s1381_s5] sm:$0xff]  }
 0xde3   :  { %v617_v38 = vpack.c.bf16 %v616_v37, %v616_v37 }
 0xde5   :  { %619 = vrot.lane.b32.xlu1 %v617_v38, %s1153_s13 }
 0xe57   :  { %v620_v39 = vpop.permute.xlu1 %619 }
 0xe58   :  { %1044 = vmatmul.mubr.msk.bf16.vlgmr.msra.gmra.mxu1 %vm260_vm3, %v620_v39 }
 0xe59   :  { %1056 = vmatpush3.bf16.msra.mxu1 %v1212_v10  ;;  %1059 = vmatprep.mubr.msk.bf16.mxu1 %vm1151_vm4, %v1150_v8 }
 0xe5a   :  { %1057 = vmatprep.subr.bf16.mxu1 %v1150_v8 }
 0xe5d   :  { %1058 = vmatpush3.bf16.msra.mxu1 %v1219_v11 }
 0xf18   :  { %v658_v42 = vpop.f32.mrf.mxu1 }
 0xf19   :  { %v664_v45 = vadd.f32 %v658_v42, %v235_v41 }
 0xf1a   :  { %v1045_v47 = vpop.f32.mrf.mxu1 }
 0xf1b   :  { %1125 = vtanh.f32 %v664_v45  ;;  %v934_v10 = vmul.f32 -1.442695, %v664_v45  ;;  %v838_v45 = vld [vmem:[%s1381_s5 + $0x10] sm:$0x1] }
 0xf1c   :  { %v661_v48 = vpop.f32.mrf.mxu1  ;;  %v839_v47 = vunpack.c.l.bf16 %v838_v45 }
 0xf1d   :  { %1127 = vpow2.f32 %v934_v10 }
 0xf1e   :  { %v1046_v49 = vpop.f32.mrf.mxu1 }
 0xf28   :  { %v1126_v50 = vpop.eup %1125 }
 0xf29   :  { %674 = vrot.lane.b32.xlu0 %v1126_v50, %s1152_s3 }
 0xf2a   :  { %v1128_v52 = vpop.eup %1127 }
 0xf2b   :  { %v668_v53 = vadd.f32 1.0, %v1128_v52 }
 0xf2d   :  { %1129 = vrcp.f32 %v668_v53 }
 0xf3a   :  { %v1130_v46 = vpop.eup %1129 }
 0xf3b   :  { %v672_v44 = vmul.f32 %v1130_v46, %v610_v56 }
 0xf9b   :  { %v675_v55 = vpop.permute.xlu0 %674 }
 0xf9c   :  { %v677_v11 = vmul.f32 %v1130_v46, %v675_v55 }
 0xf9e   :  { %679 = vrot.lane.b32.xlu1 %v677_v11, %s1153_s13 }
0x1010   :  { %v680_v13 = vpop.permute.xlu1 %679 }
0x1011   :  { %v682_v57 = vadd.f32 %v680_v13, %v672_v44 }
0x1013   :  { %1131 = vtanh.f32 %v682_v57 }
0x1020   :  { %v1132_v59 = vpop.eup %1131 }
0x1021   :  { %685 = vrot.lane.b32.xlu0 %v1132_v59, %s1152_s3 }
0x1093   :  { %v686_v60 = vpop.permute.xlu0 %685 }
0x1094   :  { %v688_v61 = vmul.f32 %v1130_v46, %v686_v60 }
0x1096   :  { %v689_v62 = vpack.c.bf16 %v688_v61, %v688_v61 }
0x1098   :  { %691 = vrot.lane.b32.xlu1 %v689_v62, %s1153_s13 }
0x110a   :  { %v692_v63 = vpop.permute.xlu1 %691 }
0x110b   :  { %1052 = vmatmul.mubr.msk.bf16.vlgmr.msra.gmra.mxu0 %vm260_vm3, %v692_v63 }
0x110c   :  { %1067 = vmatprep.mubr.msk.bf16.mxu0 %vm1151_vm4, %v1150_v8  ;;  %1064 = vmatpush3.bf16.msra.mxu0 %v1083_v35 }
0x110d   :  { %1065 = vmatprep.subr.bf16.mxu0 %v1150_v8  ;;  %v843_v8 = vrot.slane %v839_v47, %v160_v43 }
0x1110   :  { %1066 = vmatpush3.bf16.msra.mxu0 %v1084_v36 }
0x11cb   :  { %v730_v0 = vpop.f32.mrf.mxu0 }
0x11cc   :  { %v736_v1 = vadd.f32 %v730_v0, %v1271_v54 }
0x11cd   :  { %v1053_v2 = vpop.f32.mrf.mxu0 }
0x11ce   :  { %1133 = vtanh.f32 %v736_v1  ;;  %v936_v6 = vmul.f32 -1.442695, %v736_v1 }
0x11cf   :  { %v733_v3 = vpop.f32.mrf.mxu0 }
0x11d0   :  { %1135 = vpow2.f32 %v936_v6 }
0x11d1   :  { %v1054_v4 = vpop.f32.mrf.mxu0 }
0x11db   :  { %v1134_v5 = vpop.eup %1133 }
0x11dc   :  { %746 = vrot.lane.b32.xlu0 %v1134_v5, %s1152_s3 }
0x11dd   :  { %v1136_v7 = vpop.eup %1135 }
0x11de   :  { %v740_v9 = vadd.f32 1.0, %v1136_v7 }
0x11e0   :  { %1137 = vrcp.f32 %v740_v9 }
0x11ed   :  { %v1138_v12 = vpop.eup %1137 }
0x11ee   :  { %v744_v51 = vmul.f32 %v1138_v12, %v682_v57 }
0x124e   :  { %v747_v14 = vpop.permute.xlu0 %746 }
0x124f   :  { %v749_v15 = vmul.f32 %v1138_v12, %v747_v14 }
0x1251   :  { %751 = vrot.lane.b32.xlu1 %v749_v15, %s1153_s13 }
0x12c3   :  { %v752_v16 = vpop.permute.xlu1 %751 }
0x12c4   :  { %v754_v54 = vadd.f32 %v752_v16, %v744_v51 }
0x12c6   :  { %1139 = vtanh.f32 %v754_v54 }
0x12d3   :  { %v1140_v17 = vpop.eup %1139 }
0x12d4   :  { %757 = vrot.lane.b32.xlu0 %v1140_v17, %s1152_s3 }
0x1346   :  { %v758_v18 = vpop.permute.xlu0 %757 }
0x1347   :  { %v760_v19 = vmul.f32 %v1138_v12, %v758_v18 }
0x1349   :  { %v761_v20 = vpack.c.bf16 %v760_v19, %v760_v19 }
0x134b   :  { %763 = vrot.lane.b32.xlu1 %v761_v20, %s1153_s13 }
0x13bd   :  { %v764_v21 = vpop.permute.xlu1 %763 }
0x13be   :  { %1060 = vmatmul.mubr.msk.bf16.vlgmr.msra.gmra.mxu1 %vm260_vm3, %v764_v21 }
0x147e   :  { %v802_v22 = vpop.f32.mrf.mxu1 }
0x147f   :  { %v808_v23 = vadd.f32 %v802_v22, %v1277_v58 }
0x1480   :  { %v1061_v24 = vpop.f32.mrf.mxu1 }
0x1481   :  { %1141 = vtanh.f32 %v808_v23  ;;  %v938_v28 = vmul.f32 -1.442695, %v808_v23 }
0x1482   :  { %v805_v25 = vpop.f32.mrf.mxu1 }
0x1483   :  { %1143 = vpow2.f32 %v938_v28 }
0x1484   :  { %v1062_v26 = vpop.f32.mrf.mxu1 }
0x148e   :  { %v1142_v27 = vpop.eup %1141 }
0x148f   :  { %818 = vrot.lane.b32.xlu0 %v1142_v27, %s1152_s3 }
0x1490   :  { %v1144_v29 = vpop.eup %1143 }
0x1491   :  { %v812_v30 = vadd.f32 1.0, %v1144_v29 }
0x1493   :  { %1145 = vrcp.f32 %v812_v30 }
0x14a0   :  { %v1146_v31 = vpop.eup %1145 }
0x14a1   :  { %v816_v34 = vmul.f32 %v1146_v31, %v754_v54 }
0x1501   :  { %v819_v32 = vpop.permute.xlu0 %818 }
0x1502   :  { %v821_v33 = vmul.f32 %v1146_v31, %v819_v32 }
0x1504   :  { %823 = vrot.lane.b32.xlu1 %v821_v33, %s1153_s13 }
0x1576   :  { %v824_v56 = vpop.permute.xlu1 %823 }
0x1577   :  { %v826_v58 = vadd.f32 %v824_v56, %v816_v34 }
0x1579   :  { %1147 = vtanh.f32 %v826_v58 }
0x1586   :  { %v1148_v37 = vpop.eup %1147 }
0x1587   :  { %829 = vrot.lane.b32.xlu0 %v1148_v37, %s1152_s3 }
0x15f9   :  { %v830_v38 = vpop.permute.xlu0 %829 }
0x15fa   :  { %v832_v39 = vmul.f32 %v1146_v31, %v830_v38 }
0x15fc   :  { %v833_v41 = vpack.c.bf16 %v832_v39, %v832_v39 }
0x15fe   :  { %845 = vrot.lane.b32.xlu1 %v833_v41, %s1153_s13 }
0x1670   :  { %v846_v42 = vpop.permute.xlu1 %845 }
0x1671   :  { %1068 = vmatmul.mubr.msk.bf16.vlgmr.msra.gmra.mxu0 %vm260_vm3, %v846_v42 }
0x1731   :  { %v896_v48 = vpop.f32.mrf.mxu0 }
0x1732   :  { %v897_v49 = vadd.f32 %v896_v48, %v843_v8 }
0x1733   :  { %v1069_v50 = vpop.f32.mrf.mxu0 }
0x1734   :  { %903 = vst.msk [vmem:[%s1382_s6] sm:$0xff] %vm902_vm6, %v897_v49 }
0x1735   :  { %v899_v10 = vpop.f32.mrf.mxu0 }
0x1737   :  { %v1070_v52 = vpop.f32.mrf.mxu0 }

</bundles_post_ra>
